<compile_context>
chip_gen: v6e
topology: v6e:2x2x1
jax: 0.10.0
libtpu: 0.0.40
codegen_flags: <defaults>
</compile_context>

<pallas_src>
import functools

import jax
import jax.numpy as jnp
from jax.experimental import pallas as pl
from jax.experimental.pallas import tpu as pltpu

_LANE = 128     # vreg lane width
_SUBLANE = 8    # vreg sublane count (f32)


def _round_up(n, m):
    return ((n + m - 1) // m) * m


def _fused_mlp_kernel(*refs, n_layers, n_masks, drop_rate):
    """Fused MLP: ((x @ W0 + b0).relu().dropout()) ... @ W_last + b_last.

    refs layout (all VMEM, all lane/sublane padded):
      refs[0]                      : x        (Bp, D0p) f32
      refs[1 : 1+2*n_layers]       : W_i, b_i pairs, W_i (D_ip, D_{i+1}p),
                                     b_i (1, D_{i+1}p)
      next n_masks refs            : uint32 random bits (Bp, D_{i+1}p) for the
                                     dropout mask of hidden layer i
      refs[-1]                     : output   (Bp, DLp) f32
    """
    x_ref = refs[0]
    wb_refs = refs[1:1 + 2 * n_layers]
    mask_refs = refs[1 + 2 * n_layers: 1 + 2 * n_layers + n_masks]
    o_ref = refs[-1]

    if n_masks > 0:
        # keep an element iff bits >= p * 2^32  ->  P(keep) = 1 - p
        thresh = jnp.uint32(min(int(round(drop_rate * (2.0 ** 32))), 2 ** 32 - 1))
        inv_keep = jnp.float32(1.0 / (1.0 - drop_rate))

    h = x_ref[...]
    for i in range(n_layers):
        w = wb_refs[2 * i][...]
        b = wb_refs[2 * i + 1][...]
        h = jnp.dot(h, w, preferred_element_type=jnp.float32) + b
        if i < n_layers - 1:                       # hidden layer: ReLU + dropout
            h = jnp.maximum(h, 0.0)
            if n_masks > 0:
                keep = mask_refs[i][...] >= thresh
                h = jnp.where(keep, h * inv_keep, 0.0)
        # last layer: identity output activation
    o_ref[...] = h.astype(o_ref.dtype)


def dropout_mlp_forward(params, x, *, drop_rate=0.1, training=True,
                        rng_key=None, return_preactivations=False):
    """Forward pass of Dropout_Mlp (layer_norm=False, spectral_norm=False).

    params: list of (W, b) with W stored (in_features, out_features).
    Dropout is applied to every hidden activation when training=True.
    """
    B, din = x.shape
    n_layers = len(params)
    out_size = params[-1][0].shape[1]
    apply_dropout = bool(training) and drop_rate > 0.0 and n_layers > 1
    n_masks = (n_layers - 1) if apply_dropout else 0

    # padded (lane-dense) dims
    dims = [din] + [w.shape[1] for (w, _) in params]
    dims_p = [max(_round_up(d, _LANE), _LANE) for d in dims]
    Bp = max(_round_up(B, _SUBLANE), _SUBLANE)

    # --- build padded inputs -------------------------------------------------
    xp = jnp.zeros((Bp, dims_p[0]), jnp.float32)
    xp = xp.at[:B, :din].set(x.astype(jnp.float32))

    inputs = [xp]
    in_specs = [pl.BlockSpec(memory_space=pltpu.MemorySpace.VMEM)]
    for i, (w, b) in enumerate(params):
        di, do = w.shape
        wp = jnp.zeros((dims_p[i], dims_p[i + 1]), jnp.float32)
        wp = wp.at[:di, :do].set(w.astype(jnp.float32))
        bp = jnp.zeros((1, dims_p[i + 1]), jnp.float32)
        bp = bp.at[:, :do].set(b.reshape(1, do).astype(jnp.float32))
        inputs += [wp, bp]
        in_specs += [pl.BlockSpec(memory_space=pltpu.MemorySpace.VMEM)] * 2

    if apply_dropout:
        if rng_key is None:
            rng_key = jax.random.PRNGKey(0)
        keys = jax.random.split(rng_key, n_masks)
        for i in range(n_masks):
            bits = jax.random.bits(keys[i], (Bp, dims_p[i + 1]), jnp.uint32)
            inputs.append(bits)
            in_specs.append(pl.BlockSpec(memory_space=pltpu.MemorySpace.VMEM))

    kernel = functools.partial(
        _fused_mlp_kernel,
        n_layers=n_layers,
        n_masks=n_masks,
        drop_rate=drop_rate if apply_dropout else 0.0,
    )

    # TODO(synk): for large batch / hidden sizes, add a parallel batch grid
    # axis and tile Dout/K with BlockSpecs + f32 accumulator (v7x 64 MiB VMEM).
    out_p = pl.pallas_call(
        kernel,
        out_shape=jax.ShapeDtypeStruct((Bp, dims_p[-1]), jnp.float32),
        in_specs=in_specs,
        out_specs=pl.BlockSpec(memory_space=pltpu.MemorySpace.VMEM),
    )(*inputs)

    out = out_p[:B, :out_size]
    if return_preactivations:
        return out, out            # output_activation = identity
    return out


def init_dropout_mlp_params(key, input_size, hidden_sizes, output_size,
                            init_w=0.003, b_init_value=0.1):
    """Init matching the PyTorch module's __init__ (weights stored (in, out)).

    Hidden layers: fanin_init (uniform +-1/sqrt(fan_in)), bias = 0.1.
    Last layer: uniform(-init_w, init_w) for weight and bias.
    """
    params = []
    in_size = input_size
    for h in hidden_sizes:
        key, wk = jax.random.split(key)
        bound = 1.0 / float(jnp.sqrt(jnp.float32(in_size)))
        w = jax.random.uniform(wk, (in_size, h), jnp.float32, -bound, bound)
        b = jnp.full((h,), b_init_value, dtype=jnp.float32)
        params.append((w, b))
        in_size = h
    key, wk, bk = jax.random.split(key, 3)
    w_last = jax.random.uniform(wk, (in_size, output_size), jnp.float32,
                                -init_w, init_w)
    b_last = jax.random.uniform(bk, (output_size,), jnp.float32,
                                -init_w, init_w)
    params.append((w_last, b_last))
    return params


def _reference_forward_no_dropout(params, x):
    """Pure-JAX eval-mode reference (dropout disabled) for a sanity check."""
    h = x.astype(jnp.float32)
    for w, b in params[:-1]:
        h = jnp.maximum(h @ w + b, 0.0)
    w, b = params[-1]
    return h @ w + b


if __name__ == "__main__":
    # Small shapes consistent with the module: batch=8, input=32,
    # hidden_sizes=(64, 64), output=8.
    batch, input_size = 8, 32
    hidden_sizes = (64, 64)
    output_size = 8

    key = jax.random.PRNGKey(0)
    pkey, xkey, dkey = jax.random.split(key, 3)
    params = init_dropout_mlp_params(pkey, input_size, hidden_sizes, output_size)
    x = jax.random.normal(xkey, (batch, input_size), dtype=jnp.float32)

    # Training-mode forward (dropout applied, fresh mask from dkey).
    out = dropout_mlp_forward(params, x, drop_rate=0.1, training=True,
                              rng_key=dkey)
    out = jax.block_until_ready(out)
    assert out.shape == (batch, output_size)
    assert out.dtype == jnp.float32

    # Eval-mode forward (no dropout) must match the pure-JAX reference.
    out_eval = dropout_mlp_forward(params, x, drop_rate=0.1, training=False)
    out_eval = jax.block_until_ready(out_eval)
    ref_eval = _reference_forward_no_dropout(params, x)
    assert jnp.allclose(out_eval, ref_eval, atol=1e-5, rtol=1e-5)

    print("KERNEL_OK")
</pallas_src>

<mosaic_0001>
module attributes {stable_mosaic.version = 11 : i64} {
  func.func @_fused_mlp_kernel(%arg0: memref<8x128xf32, #tpu.memory_space<vmem>>, %arg1: memref<128x128xf32, #tpu.memory_space<vmem>>, %arg2: memref<1x128xf32, #tpu.memory_space<vmem>>, %arg3: memref<128x128xf32, #tpu.memory_space<vmem>>, %arg4: memref<1x128xf32, #tpu.memory_space<vmem>>, %arg5: memref<128x128xf32, #tpu.memory_space<vmem>>, %arg6: memref<1x128xf32, #tpu.memory_space<vmem>>, %arg7: memref<8x128xi32, #tpu.memory_space<vmem>>, %arg8: memref<8x128xi32, #tpu.memory_space<vmem>>, %arg9: memref<8x128xf32, #tpu.memory_space<vmem>>) attributes {dimension_semantics = [], scalar_prefetch = 0 : i64, scratch_operands = 0 : i64, tpu.core_type = #tpu.core_type<tc>} {
    %c0 = arith.constant 0 : index
    %c0_0 = arith.constant 0 : index
    %0 = vector.load %arg0[%c0, %c0_0] : memref<8x128xf32, #tpu.memory_space<vmem>>, vector<8x128xf32>
    %c0_1 = arith.constant 0 : index
    %c0_2 = arith.constant 0 : index
    %1 = vector.load %arg1[%c0_1, %c0_2] : memref<128x128xf32, #tpu.memory_space<vmem>>, vector<128x128xf32>
    %c0_3 = arith.constant 0 : index
    %c0_4 = arith.constant 0 : index
    %2 = vector.load %arg2[%c0_3, %c0_4] : memref<1x128xf32, #tpu.memory_space<vmem>>, vector<1x128xf32>
    %cst = arith.constant dense<0.000000e+00> : vector<8x128xf32>
    %3 = tpu.matmul %0, %1, %cst {dimension_numbers = #tpu.dot_dimension_numbers<[1], [0], [0], [1], [0, 0, 1, 1], [], []>} : vector<8x128xf32>, vector<128x128xf32>, vector<8x128xf32> -> vector<8x128xf32>
    %4 = vector.broadcast %2 : vector<1x128xf32> to vector<8x128xf32>
    %5 = arith.addf %3, %4 : vector<8x128xf32>
    %cst_5 = arith.constant 0.000000e+00 : f32
    %6 = vector.broadcast %cst_5 : f32 to vector<8x128xf32>
    %7 = arith.maximumf %5, %6 : vector<8x128xf32>
    %c0_6 = arith.constant 0 : index
    %c0_7 = arith.constant 0 : index
    %8 = vector.load %arg7[%c0_6, %c0_7] : memref<8x128xi32, #tpu.memory_space<vmem>>, vector<8x128xi32>
    %c429496730_i32 = arith.constant 429496730 : i32
    %9 = vector.broadcast %c429496730_i32 : i32 to vector<8x128xi32>
    %10 = arith.cmpi uge, %8, %9 : vector<8x128xi32>
    %cst_8 = arith.constant 1.11111116 : f32
    %11 = vector.broadcast %cst_8 : f32 to vector<8x128xf32>
    %12 = arith.mulf %7, %11 : vector<8x128xf32>
    %cst_9 = arith.constant 0.000000e+00 : f32
    %13 = vector.broadcast %cst_9 : f32 to vector<8x128xf32>
    %14 = arith.select %10, %12, %13 : vector<8x128xi1>, vector<8x128xf32>
    %c0_10 = arith.constant 0 : index
    %c0_11 = arith.constant 0 : index
    %15 = vector.load %arg3[%c0_10, %c0_11] : memref<128x128xf32, #tpu.memory_space<vmem>>, vector<128x128xf32>
    %c0_12 = arith.constant 0 : index
    %c0_13 = arith.constant 0 : index
    %16 = vector.load %arg4[%c0_12, %c0_13] : memref<1x128xf32, #tpu.memory_space<vmem>>, vector<1x128xf32>
    %cst_14 = arith.constant dense<0.000000e+00> : vector<8x128xf32>
    %17 = tpu.matmul %14, %15, %cst_14 {dimension_numbers = #tpu.dot_dimension_numbers<[1], [0], [0], [1], [0, 0, 1, 1], [], []>} : vector<8x128xf32>, vector<128x128xf32>, vector<8x128xf32> -> vector<8x128xf32>
    %18 = vector.broadcast %16 : vector<1x128xf32> to vector<8x128xf32>
    %19 = arith.addf %17, %18 : vector<8x128xf32>
    %cst_15 = arith.constant 0.000000e+00 : f32
    %20 = vector.broadcast %cst_15 : f32 to vector<8x128xf32>
    %21 = arith.maximumf %19, %20 : vector<8x128xf32>
    %c0_16 = arith.constant 0 : index
    %c0_17 = arith.constant 0 : index
    %22 = vector.load %arg8[%c0_16, %c0_17] : memref<8x128xi32, #tpu.memory_space<vmem>>, vector<8x128xi32>
    %c429496730_i32_18 = arith.constant 429496730 : i32
    %23 = vector.broadcast %c429496730_i32_18 : i32 to vector<8x128xi32>
    %24 = arith.cmpi uge, %22, %23 : vector<8x128xi32>
    %cst_19 = arith.constant 1.11111116 : f32
    %25 = vector.broadcast %cst_19 : f32 to vector<8x128xf32>
    %26 = arith.mulf %21, %25 : vector<8x128xf32>
    %cst_20 = arith.constant 0.000000e+00 : f32
    %27 = vector.broadcast %cst_20 : f32 to vector<8x128xf32>
    %28 = arith.select %24, %26, %27 : vector<8x128xi1>, vector<8x128xf32>
    %c0_21 = arith.constant 0 : index
    %c0_22 = arith.constant 0 : index
    %29 = vector.load %arg5[%c0_21, %c0_22] : memref<128x128xf32, #tpu.memory_space<vmem>>, vector<128x128xf32>
    %c0_23 = arith.constant 0 : index
    %c0_24 = arith.constant 0 : index
    %30 = vector.load %arg6[%c0_23, %c0_24] : memref<1x128xf32, #tpu.memory_space<vmem>>, vector<1x128xf32>
    %cst_25 = arith.constant dense<0.000000e+00> : vector<8x128xf32>
    %31 = tpu.matmul %28, %29, %cst_25 {dimension_numbers = #tpu.dot_dimension_numbers<[1], [0], [0], [1], [0, 0, 1, 1], [], []>} : vector<8x128xf32>, vector<128x128xf32>, vector<8x128xf32> -> vector<8x128xf32>
    %32 = vector.broadcast %30 : vector<1x128xf32> to vector<8x128xf32>
    %33 = arith.addf %31, %32 : vector<8x128xf32>
    %c0_26 = arith.constant 0 : index
    %c0_27 = arith.constant 0 : index
    %34 = vector.load %arg9[%c0_26, %c0_27] : memref<8x128xf32, #tpu.memory_space<vmem>>, vector<8x128xf32>
    tpu.vector_store %arg9[%c0_26, %c0_27], %33 {strides = array<i32>} : memref<8x128xf32, #tpu.memory_space<vmem>>, vector<8x128xf32>,
    return
  }
}

</mosaic_0001>

<bundles_post_ra>
// kernel: tpu_custom_call.1
= control target key start
LH: loop header
LB: loop body
LE: loop exit
PB: predicated region body
PF: predicated region fallthrough
CT: control target
= control target key end

     0   :  { %14 = vsyncpa [#allocation3], 0  ;;  %s857_s0 = inlined_call_operand.hbm [shape: f32[8,128], index: 0, kind: input, shape index: {}]   ;;  %s858_s1 = inlined_call_operand.hbm [shape: f32[128,128], index: 1, kind: input, shape index: {}]   ;;  %s859_s2 = inlined_call_operand.vmem [shape: f32[1,128], index: 2, kind: input, shape index: {}]   ;;  %s860_s3 = inlined_call_operand.hbm [shape: f32[128,128], index: 3, kind: input, shape index: {}]   ;;  %s861_s4 = inlined_call_operand.vmem [shape: f32[1,128], index: 4, kind: input, shape index: {}]   ;;  %s862_s5 = inlined_call_operand.hbm [shape: f32[128,128], index: 5, kind: input, shape index: {}]   ;;  %s863_s6 = inlined_call_operand.vmem [shape: f32[1,128], index: 6, kind: input, shape index: {}]   ;;  %s864_s7 = inlined_call_operand.vmem [shape: u32[8,128], index: 7, kind: input, shape index: {}]   ;;  %s865_s8 = inlined_call_operand.hbm [shape: u32[8,128], index: 8, kind: input, shape index: {}]   ;;  %s866_s9 = inlined_call_operand.hbm [shape: f32[8,128], index: 9, kind: output, shape index: {}]  }
   0x1   :  { %15 = vsyncpa [#allocation6], 0 }
   0x2   :  { %16 = vsyncpa [#allocation9], 0 }
   0x3   :  { %17 = vsyncpa [#allocation4], 0  ;;  %s704_s30 = smov [#allocation5]  }
   0x4   :  { %s33_s10 = sshll.u32 %s704_s30, 4  ;;  %s34_s10 = int_to_ptr.vmem [resolvable:$true] %s33_s10 }
   0x5   :  { %s584_s11 = scalar_lea.vmem %s34_s10, 2048  ;;  %p589_p1 = scmp.lt.s32.totalorder %s34_s10, %s34_s10 }
   0x6   :  { %p585_p0 = scmp.ne.s32.totalorder %s34_s10, %s584_s11  ;;  %p590_p2 = scmp.lt.s32.totalorder %s584_s11, %s584_s11 }
   0x8   :  { %p591_p3 = por %p590_p2, %p589_p1 }
   0xa   :  { %p592_p4 = pnand %p591_p3, %p585_p0 }
   0xc   :  { %595 = shalt.err (!%p592_p4)
}
   0xd   :  { %s705_s12 = smov 128   ;;  %s706_s13 = smov 8  }
   0xe   :  { %39 = dma.hbm_to_vmem [thread:$0]  %s858_s1, 2048, %s34_s10, [#allocation6], %s705_s12, %s705_s12, %s706_s13  }
   0xf   :  { %s707_s16 = smov [#allocation8]   ;;  %s708_s18 = smov [#allocation2]  }
  0x10   :  { %s61_s17 = sshll.u32 %s707_s16, 4  ;;  %s24_s19 = sshll.u32 %s708_s18, 4  ;;  %s62_s17 = int_to_ptr.vmem [resolvable:$true] %s61_s17  ;;  %s25_s19 = int_to_ptr.vmem [resolvable:$true] %s24_s19 }
  0x11   :  { %s604_s20 = scalar_lea.vmem %s62_s17, 2048  ;;  %p609_p6 = scmp.lt.s32.totalorder %s62_s17, %s62_s17 }
  0x12   :  { %p605_p5 = scmp.ne.s32.totalorder %s62_s17, %s604_s20  ;;  %p610_p7 = scmp.lt.s32.totalorder %s604_s20, %s604_s20 }
  0x14   :  { %p611_p8 = por %p610_p7, %p609_p6 }
  0x16   :  { %p612_p9 = pnand %p611_p8, %p605_p5 }
  0x18   :  { %615 = shalt.err (!%p612_p9)
}
  0x19   :  { %67 = dma.hbm_to_vmem [thread:$0]  %s862_s5, 2048, %s62_s17, [#allocation9], %s705_s12, %s705_s12, %s706_s13  }
  0x1a   :  { %s624_s1 = scalar_lea.vmem %s25_s19, 128  ;;  %p629_p11 = scmp.lt.s32.totalorder %s25_s19, %s25_s19 }
  0x1b   :  { %p625_p10 = scmp.ne.s32.totalorder %s25_s19, %s624_s1  ;;  %p630_p12 = scmp.lt.s32.totalorder %s624_s1, %s624_s1 }
  0x1d   :  { %p631_p13 = por %p630_p12, %p629_p11 }
  0x1f   :  { %p632_p0 = pnand %p631_p13, %p625_p10 }
  0x21   :  { %635 = shalt.err (!%p632_p0)
}
  0x22   :  { %27 = dma.hbm_to_vmem [thread:$0]  %s857_s0, 128, %s25_s19, [#allocation3]  }
  0x23   :  { %s709_s25 = smov [#allocation7]   ;;  %s710_s27 = smov [#allocation10]  }
  0x24   :  { %s47_s26 = sshll.u32 %s709_s25, 4  ;;  %s78_s28 = sshll.u32 %s710_s27, 4  ;;  %s48_s26 = int_to_ptr.vmem [resolvable:$true] %s47_s26  ;;  %s79_s28 = int_to_ptr.vmem [resolvable:$true] %s78_s28 }
  0x25   :  { %s644_s29 = scalar_lea.vmem %s48_s26, 2048  ;;  %p649_p2 = scmp.lt.s32.totalorder %s48_s26, %s48_s26 }
  0x26   :  { %p645_p1 = scmp.ne.s32.totalorder %s48_s26, %s644_s29  ;;  %p650_p3 = scmp.lt.s32.totalorder %s644_s29, %s644_s29 }
  0x28   :  { %p651_p4 = por %p650_p3, %p649_p2 }
  0x2a   :  { %p652_p5 = pnand %p651_p4, %p645_p1 }
  0x2c   :  { %655 = shalt.err (!%p652_p5)
}
  0x2d   :  { %53 = dma.hbm_to_vmem [thread:$0]  %s860_s3, 2048, %s48_s26, [#allocation6], %s705_s12, %s705_s12, %s706_s13  }
  0x2e   :  { %s664_s0 = scalar_lea.vmem %s79_s28, 128  ;;  %p669_p7 = scmp.lt.s32.totalorder %s79_s28, %s79_s28 }
  0x2f   :  { %p665_p6 = scmp.ne.s32.totalorder %s79_s28, %s664_s0  ;;  %p670_p8 = scmp.lt.s32.totalorder %s664_s0, %s664_s0 }
  0x31   :  { %p671_p9 = por %p670_p8, %p669_p7 }
  0x33   :  { %p672_p10 = pnand %p671_p9, %p665_p6 }
  0x35   :  { %675 = shalt.err (!%p672_p10)
}
  0x36   :  { %81 = dma.hbm_to_vmem [thread:$0]  %s865_s8, 128, %s79_s28, [#allocation9]  }
  0x37   :  { %696 = dma.done.wait [#allocation3], 128  }
  0x38   :  { %697 = vsyncadd [#allocation3], 4294967168 }
  0x39   :  { %698 = dma.done.wait [#allocation6], 4096  }
  0x3a   :  { %699 = vsyncadd [#allocation6], 4294963200 }
  0x3b   :  { %700 = dma.done.wait [#allocation9], 2176  }
  0x3c   :  { %701 = vsyncadd [#allocation9], 4294965120  ;;  %v711_v0 = vmov 0.0   ;;  %vm712_vm0 = vmmov 0   ;;  %v113_v1 = vld [vmem:[#allocation5 + $0x78] sm:$0xff]  ;;  %v112_v2 = vld [vmem:[#allocation5 + $0x70] sm:$0xff] }
  0x3d   :  { %461 = vmatprep.subr.mxu0 %v711_v0  ;;  %493 = vmatprep.mubr.msk.f32.mxu0 %vm712_vm0, %v711_v0  ;;  %v111_v3 = vld [vmem:[#allocation5 + $0x68] sm:$0xff]  ;;  %v110_v4 = vld [vmem:[#allocation5 + $0x60] sm:$0xff]  ;;  %v211_v5 = vld [vmem:[#allocation7 + $0x78] sm:$0xff]  ;;  %s713_s16 = smov [#allocation11]  }
  0x3e   :  { %496 = vmatprep.subr.mxu1 %v711_v0  ;;  %528 = vmatprep.mubr.msk.f32.mxu1 %vm712_vm0, %v711_v0  ;;  %v109_v6 = vld [vmem:[#allocation5 + $0x58] sm:$0xff]  ;;  %v210_v7 = vld [vmem:[#allocation7 + $0x70] sm:$0xff]  ;;  %v209_v8 = vld [vmem:[#allocation7 + $0x68] sm:$0xff]  ;;  %s394_s17 = sshll.u32 %s713_s16, 4  ;;  %s395_s17 = int_to_ptr.vmem [resolvable:$true] %s394_s17 }
  0x3f   :  { %462 = vmatpush3.msra.mxu0 %v113_v1  ;;  %497 = vmatpush3.msra.mxu1 %v211_v5  ;;  %v108_v9 = vld [vmem:[#allocation5 + $0x50] sm:$0xff]  ;;  %v208_v10 = vld [vmem:[#allocation7 + $0x60] sm:$0xff]  ;;  %v107_v11 = vld [vmem:[#allocation5 + $0x48] sm:$0xff]  ;;  %p681_p12 = scmp.lt.s32.totalorder %s395_s17, %s395_s17 }
  0x40   :  { %463 = vmatprep.subr.mxu0 %v711_v0  ;;  %498 = vmatprep.subr.mxu1 %v711_v0  ;;  %v207_v12 = vld [vmem:[#allocation7 + $0x58] sm:$0xff]  ;;  %v106_v13 = vld [vmem:[#allocation5 + $0x40] sm:$0xff]  ;;  %v206_v14 = vld [vmem:[#allocation7 + $0x50] sm:$0xff] }
  0x41   :  { %464 = vmatpush3.msra.mxu0 %v112_v2  ;;  %499 = vmatpush3.msra.mxu1 %v210_v7  ;;  %v105_v15 = vld [vmem:[#allocation5 + $0x38] sm:$0xff]  ;;  %v205_v16 = vld [vmem:[#allocation7 + $0x48] sm:$0xff]  ;;  %v104_v17 = vld [vmem:[#allocation5 + $0x30] sm:$0xff] }
  0x42   :  { %465 = vmatprep.subr.mxu0 %v711_v0  ;;  %500 = vmatprep.subr.mxu1 %v711_v0  ;;  %v204_v18 = vld [vmem:[#allocation7 + $0x40] sm:$0xff]  ;;  %v103_v19 = vld [vmem:[#allocation5 + $0x28] sm:$0xff]  ;;  %v203_v20 = vld [vmem:[#allocation7 + $0x38] sm:$0xff] }
  0x43   :  { %466 = vmatpush3.msra.mxu0 %v111_v3  ;;  %501 = vmatpush3.msra.mxu1 %v209_v8  ;;  %v102_v21 = vld [vmem:[#allocation5 + $0x20] sm:$0xff]  ;;  %v202_v22 = vld [vmem:[#allocation7 + $0x30] sm:$0xff]  ;;  %v101_v23 = vld [vmem:[#allocation5 + $0x18] sm:$0xff] }
  0x44   :  { %467 = vmatprep.subr.mxu0 %v711_v0  ;;  %502 = vmatprep.subr.mxu1 %v711_v0  ;;  %v201_v24 = vld [vmem:[#allocation7 + $0x28] sm:$0xff]  ;;  %v100_v25 = vld [vmem:[#allocation5 + $0x10] sm:$0xff]  ;;  %v200_v26 = vld [vmem:[#allocation7 + $0x20] sm:$0xff] }
  0x45   :  { %468 = vmatpush3.msra.mxu0 %v110_v4  ;;  %503 = vmatpush3.msra.mxu1 %v208_v10  ;;  %v99_v27 = vld [vmem:[#allocation5 + $0x8] sm:$0xff]  ;;  %v98_v28 = vld [vmem:[#allocation5] sm:$0xff]  ;;  %v97_v29 = vld [vmem:[#allocation2] sm:$0xff] }
  0x46   :  { %469 = vmatprep.subr.mxu0 %v711_v0  ;;  %504 = vmatprep.subr.mxu1 %v711_v0  ;;  %v199_v30 = vld [vmem:[#allocation7 + $0x18] sm:$0xff]  ;;  %v198_v31 = vld [vmem:[#allocation7 + $0x10] sm:$0xff]  ;;  %v197_v32 = vld [vmem:[#allocation7 + $0x8] sm:$0xff] }
  0x47   :  { %470 = vmatpush3.msra.mxu0 %v109_v6  ;;  %505 = vmatpush3.msra.mxu1 %v207_v12  ;;  %v196_v33 = vld [vmem:[#allocation7] sm:$0xff]  ;;  %v309_v34 = vld [vmem:[#allocation8 + $0x78] sm:$0xff]  ;;  %v308_v35 = vld [vmem:[#allocation8 + $0x70] sm:$0xff] }
  0x48   :  { %471 = vmatprep.subr.mxu0 %v711_v0  ;;  %506 = vmatprep.subr.mxu1 %v711_v0  ;;  %v307_v36 = vld [vmem:[#allocation8 + $0x68] sm:$0xff]  ;;  %v306_v37 = vld [vmem:[#allocation8 + $0x60] sm:$0xff]  ;;  %v305_v38 = vld [vmem:[#allocation8 + $0x58] sm:$0xff] }
  0x49   :  { %472 = vmatpush3.msra.mxu0 %v108_v9  ;;  %507 = vmatpush3.msra.mxu1 %v206_v14  ;;  %v304_v39 = vld [vmem:[#allocation8 + $0x50] sm:$0xff]  ;;  %v303_v40 = vld [vmem:[#allocation8 + $0x48] sm:$0xff]  ;;  %v302_v41 = vld [vmem:[#allocation8 + $0x40] sm:$0xff] }
  0x4a   :  { %473 = vmatprep.subr.mxu0 %v711_v0  ;;  %508 = vmatprep.subr.mxu1 %v711_v0  ;;  %v301_v42 = vld [vmem:[#allocation8 + $0x38] sm:$0xff]  ;;  %v300_v43 = vld [vmem:[#allocation8 + $0x30] sm:$0xff]  ;;  %v299_v44 = vld [vmem:[#allocation8 + $0x28] sm:$0xff] }
  0x4b   :  { %474 = vmatpush3.msra.mxu0 %v107_v11  ;;  %509 = vmatpush3.msra.mxu1 %v205_v16  ;;  %v298_v45 = vld [vmem:[#allocation8 + $0x20] sm:$0xff]  ;;  %v405_v46 = vld [vmem:[%s859_s2] ss:$0 sm:$0xff]  ;;  %v296_v54 = vld [vmem:[#allocation8 + $0x10] sm:$0xff] }
  0x4c   :  { %475 = vmatprep.subr.mxu0 %v711_v0  ;;  %510 = vmatprep.subr.mxu1 %v711_v0  ;;  %v192_v49 = vld [vmem:[%s864_s7] sm:$0xff]  ;;  %v295_v55 = vld [vmem:[#allocation8 + $0x8] sm:$0xff]  ;;  %v294_v56 = vld [vmem:[#allocation8] sm:$0xff] }
  0x4d   :  { %476 = vmatpush3.msra.mxu0 %v106_v13  ;;  %511 = vmatpush3.msra.mxu1 %v204_v18  ;;  %vm193_vm1 = vcmp.ge.u32.totalorder %v192_v49, 429496730  ;;  %v297_v53 = vld [vmem:[#allocation8 + $0x18] sm:$0xff]  ;;  %v290_v60 = vld [vmem:[#allocation10] sm:$0xff] }
  0x4e   :  { %477 = vmatprep.subr.mxu0 %v711_v0  ;;  %512 = vmatprep.subr.mxu1 %v711_v0  ;;  %v406_v57 = vld [vmem:[%s861_s4] ss:$0 sm:$0xff]  ;;  %vm291_vm2 = vcmp.ge.u32.totalorder %v290_v60, 429496730  ;;  %s676_s4 = scalar_lea.vmem %s395_s17, 128 }
  0x4f   :  { %478 = vmatpush3.msra.mxu0 %v105_v15  ;;  %513 = vmatpush3.msra.mxu1 %v203_v20  ;;  %v408_v1 = vld [vmem:[%s863_s6] ss:$0 sm:$0xff]  ;;  %p677_p11 = scmp.ne.s32.totalorder %s395_s17, %s676_s4  ;;  %p682_p13 = scmp.lt.s32.totalorder %s676_s4, %s676_s4 }
  0x50   :  { %479 = vmatprep.subr.mxu0 %v711_v0  ;;  %514 = vmatprep.subr.mxu1 %v711_v0 }
  0x51   :  { %480 = vmatpush3.msra.mxu0 %v104_v17  ;;  %515 = vmatpush3.msra.mxu1 %v202_v22  ;;  %p683_p0 = por %p682_p13, %p681_p12 }
  0x52   :  { %481 = vmatprep.subr.mxu0 %v711_v0  ;;  %516 = vmatprep.subr.mxu1 %v711_v0 }
  0x53   :  { %482 = vmatpush3.msra.mxu0 %v103_v19  ;;  %517 = vmatpush3.msra.mxu1 %v201_v24  ;;  %p684_p1 = pnand %p683_p0, %p677_p11 }
  0x54   :  { %483 = vmatprep.subr.mxu0 %v711_v0  ;;  %518 = vmatprep.subr.mxu1 %v711_v0 }
  0x55   :  { %484 = vmatpush3.msra.mxu0 %v102_v21  ;;  %519 = vmatpush3.msra.mxu1 %v200_v26 }
  0x56   :  { %485 = vmatprep.subr.mxu0 %v711_v0  ;;  %520 = vmatprep.subr.mxu1 %v711_v0 }
  0x57   :  { %486 = vmatpush3.msra.mxu0 %v101_v23  ;;  %521 = vmatpush3.msra.mxu1 %v199_v30 }
  0x58   :  { %487 = vmatprep.subr.mxu0 %v711_v0  ;;  %522 = vmatprep.subr.mxu1 %v711_v0 }
  0x59   :  { %488 = vmatpush3.msra.mxu0 %v100_v25  ;;  %523 = vmatpush3.msra.mxu1 %v198_v31 }
  0x5a   :  { %489 = vmatprep.subr.mxu0 %v711_v0  ;;  %524 = vmatprep.subr.mxu1 %v711_v0 }
  0x5b   :  { %490 = vmatpush3.msra.mxu0 %v99_v27  ;;  %525 = vmatpush3.msra.mxu1 %v197_v32 }
  0x5c   :  { %491 = vmatprep.subr.mxu0 %v711_v0  ;;  %526 = vmatprep.subr.mxu1 %v711_v0 }
  0x5d   :  { %492 = vmatpush3.msra.mxu0 %v98_v28  ;;  %527 = vmatpush3.msra.mxu1 %v196_v33 }
  0x5e   :  { %494 = vmatmul.mubr.f32.vlgmr.msra.gmra.mxu0 %v97_v29  ;;  %531 = vmatprep.subr.mxu0 %v711_v0 }
  0x5f   :  { %563 = vmatprep.mubr.msk.f32.mxu0 %vm712_vm0, %v711_v0  ;;  %532 = vmatpush3.msra.mxu0 %v309_v34 }
  0x60   :  { %533 = vmatprep.subr.mxu0 %v711_v0 }
  0x61   :  { %534 = vmatpush3.msra.mxu0 %v308_v35 }
  0x62   :  { %535 = vmatprep.subr.mxu0 %v711_v0 }
  0x63   :  { %536 = vmatpush3.msra.mxu0 %v307_v36 }
  0x64   :  { %537 = vmatprep.subr.mxu0 %v711_v0 }
  0x65   :  { %538 = vmatpush3.msra.mxu0 %v306_v37 }
  0x66   :  { %539 = vmatprep.subr.mxu0 %v711_v0 }
  0x67   :  { %540 = vmatpush3.msra.mxu0 %v305_v38 }
  0x68   :  { %541 = vmatprep.subr.mxu0 %v711_v0 }
  0x69   :  { %542 = vmatpush3.msra.mxu0 %v304_v39 }
  0x6a   :  { %543 = vmatprep.subr.mxu0 %v711_v0 }
  0x6b   :  { %544 = vmatpush3.msra.mxu0 %v303_v40 }
  0x6c   :  { %545 = vmatprep.subr.mxu0 %v711_v0 }
  0x6d   :  { %546 = vmatpush3.msra.mxu0 %v302_v41 }
  0x6e   :  { %547 = vmatprep.subr.mxu0 %v711_v0 }
  0x6f   :  { %548 = vmatpush3.msra.mxu0 %v301_v42 }
  0x70   :  { %549 = vmatprep.subr.mxu0 %v711_v0 }
  0x71   :  { %550 = vmatpush3.msra.mxu0 %v300_v43 }
  0x72   :  { %551 = vmatprep.subr.mxu0 %v711_v0 }
  0x73   :  { %552 = vmatpush3.msra.mxu0 %v299_v44 }
  0x74   :  { %553 = vmatprep.subr.mxu0 %v711_v0 }
  0x75   :  { %554 = vmatpush3.msra.mxu0 %v298_v45 }
  0x76   :  { %555 = vmatprep.subr.mxu0 %v711_v0 }
  0x77   :  { %556 = vmatpush3.msra.mxu0 %v297_v53 }
  0x78   :  { %557 = vmatprep.subr.mxu0 %v711_v0 }
  0x79   :  { %558 = vmatpush3.msra.mxu0 %v296_v54 }
  0x7a   :  { %559 = vmatprep.subr.mxu0 %v711_v0 }
  0x7b   :  { %560 = vmatpush3.msra.mxu0 %v295_v55 }
  0x7c   :  { %561 = vmatprep.subr.mxu0 %v711_v0 }
  0x7d   :  { %562 = vmatpush3.msra.mxu0 %v294_v56 }
 0x11e   :  { %v187_v47 = vpop.f32.mrf.mxu0 }
 0x11f   :  { %v188_v48 = vadd.f32 %v405_v46, %v187_v47 }
 0x120   :  { %v495_v50 = vpop.f32.mrf.mxu0 }
 0x121   :  { %v191_v51 = vmax.f32 %v188_v48, 0.0 }
 0x123   :  { %v194_v52 = vmul.f32 1.1111112, %v191_v51 }
 0x125   :  { %529 = vmatmul.mubr.msk.f32.vlgmr.msra.gmra.mxu1 %vm193_vm1, %v194_v52 }
 0x1e5   :  { %v285_v58 = vpop.f32.mrf.mxu1 }
 0x1e6   :  { %v286_v59 = vadd.f32 %v406_v57, %v285_v58 }
 0x1e7   :  { %v530_v61 = vpop.f32.mrf.mxu1 }
 0x1e8   :  { %v289_v62 = vmax.f32 %v286_v59, 0.0 }
 0x1ea   :  { %v292_v63 = vmul.f32 1.1111112, %v289_v62 }
 0x1ec   :  { %564 = vmatmul.mubr.msk.f32.vlgmr.msra.gmra.mxu0 %vm291_vm2, %v292_v63 }
 0x2ac   :  { %v383_v0 = vpop.f32.mrf.mxu0 }
 0x2ad   :  { %v384_v2 = vadd.f32 %v408_v1, %v383_v0 }
 0x2ae   :  { %v565_v3 = vpop.f32.mrf.mxu0 }
 0x2af   :  { %387 = vst [vmem:[#allocation11] sm:$0xff] %v384_v2 }
 0x2b0   :  { %687 = shalt.err (!%p684_p1)
}
 0x2b1   :  { %397 = dma.vmem_to_hbm [thread:$0]  %s395_s17, 128, %s866_s9, [#allocation4]  }
 0x2b2   :  { %702 = dma.done.wait [#allocation4], 128  }
 0x2b3   :  { %703 = vsyncadd [#allocation4], 4294967168 }
 0x2b4   :  { %401 = vsyncpa [#allocation3], 1 }
 0x2b5   :  { %402 = vsyncpa [#allocation6], 1 }
 0x2b6   :  { %403 = vsyncpa [#allocation9], 1 }
 0x2b7   :  { %404 = vsyncpa [#allocation4], 1 }

</bundles_post_ra>
